<compile_context>
chip_gen: v6e
topology: v6e:2x2x1
jax: 0.10.0
libtpu: 0.0.40
codegen_flags: <defaults>
</compile_context>

<pallas_src>
import jax
import jax.numpy as jnp
from jax import lax
from jax.experimental import pallas as pl
from jax.experimental.pallas import tpu as pltpu


# ----------------------------------------------------------------------------
# Generic tiled matmul + bias:  (N, K) @ (K, M) + b -> (N, M) f32.
# Used for (a) the hoisted, time-batched LSTM input projections and
#          (b) the final vocab projection.
# ----------------------------------------------------------------------------
def _matmul_bias_kernel(x_ref, w_ref, b_ref, o_ref, acc_ref):
    @pl.when(pl.program_id(2) == 0)
    def _():
        acc_ref[...] = jnp.zeros_like(acc_ref)

    acc_ref[...] += jnp.dot(x_ref[...], w_ref[...],
                            preferred_element_type=jnp.float32)

    @pl.when(pl.program_id(2) == pl.num_programs(2) - 1)
    def _():
        o_ref[...] = (acc_ref[...] + b_ref[...]).astype(o_ref.dtype)


def _pick_tile(dim, max_tile, align):
    """Largest aligned tile <= max_tile that divides dim; full dim if small."""
    if dim <= max_tile:
        return dim
    best = None
    t = align
    while t <= max_tile:
        if dim % t == 0:
            best = t
        t += align
    return best if best is not None else dim


def matmul_bias_pallas(x, w, b, *, max_tn=256, max_tm=512, max_tk=512):
    """x: (N, K), w: (K, M) bf16, b: (M,) f32 -> (N, M) f32."""
    N, K = x.shape
    M = w.shape[-1]
    tn = _pick_tile(N, max_tn, 8)
    tm = _pick_tile(M, max_tm, 128)
    tk = _pick_tile(K, max_tk, 128)
    grid = (N // tn, M // tm, K // tk)
    return pl.pallas_call(
        _matmul_bias_kernel,
        out_shape=jax.ShapeDtypeStruct((N, M), jnp.float32),
        grid=grid,
        in_specs=[
            pl.BlockSpec((tn, tk), lambda i, j, k: (i, k)),
            pl.BlockSpec((tk, tm), lambda i, j, k: (k, j)),
            pl.BlockSpec((1, tm), lambda i, j, k: (0, j)),
        ],
        out_specs=pl.BlockSpec((tn, tm), lambda i, j, k: (i, j)),
        scratch_shapes=[pltpu.VMEM((tn, tm), jnp.float32)],
        compiler_params=pltpu.CompilerParams(
            dimension_semantics=("parallel", "parallel", "arbitrary"),
            vmem_limit_bytes=32 * 1024 * 1024),
    )(x, w, b.reshape(1, M))


# ----------------------------------------------------------------------------
# LSTM recurrence kernel: gate pre-activations xg = x@W_ih^T + b are
# precomputed for the whole sequence; only h@W_hh^T + elementwise remain on the
# serial path.  grid=(T//TC,); each grid step runs TC timesteps in-kernel with
# h/c carried in vregs (fori_loop carry), persisted across grid steps in VMEM.
# ----------------------------------------------------------------------------
def _lstm_recurrence_kernel(xg_ref, whh_ref, h0_ref, c0_ref,
                            out_ref, hT_ref, cT_ref, h_scr, c_scr):
    step = pl.program_id(0)

    @pl.when(step == 0)
    def _():
        h_scr[...] = h0_ref[...]
        c_scr[...] = c0_ref[...]

    H = h_scr.shape[-1]
    TC = xg_ref.shape[0]
    whh = whh_ref[...]                                   # (H, 4H) bf16, once

    def body(t, carry):
        h, c = carry                                     # (B, H) f32 in vregs
        gates = xg_ref[t] + jnp.dot(h.astype(whh.dtype), whh,
                                    preferred_element_type=jnp.float32)
        i_g = jax.nn.sigmoid(gates[:, 0 * H:1 * H])
        f_g = jax.nn.sigmoid(gates[:, 1 * H:2 * H])
        g_g = jnp.tanh(gates[:, 2 * H:3 * H])
        o_g = jax.nn.sigmoid(gates[:, 3 * H:4 * H])
        c_new = f_g * c + i_g * g_g
        h_new = o_g * jnp.tanh(c_new)
        out_ref[t] = h_new.astype(out_ref.dtype)
        return h_new, c_new

    h_fin, c_fin = lax.fori_loop(0, TC, body, (h_scr[...], c_scr[...]),
                                 unroll=bool(TC <= 16))

    # Carry state to the next grid step.
    h_scr[...] = h_fin
    c_scr[...] = c_fin

    # Final states materialized only once, on the last grid step.
    @pl.when(step == pl.num_programs(0) - 1)
    def _():
        hT_ref[...] = h_fin
        cT_ref[...] = c_fin


def _pick_time_chunk(T, max_chunk=32):
    tc = min(T, max_chunk)
    while T % tc:
        tc -= 1
    return tc


def lstm_layer_pallas(x_tbe, wih_t, whh_t, bias, h0, c0):
    """One LSTM layer.  x_tbe: (T, B, E) time-major f32.
    Returns (out (T,B,H) f32, hT (B,H) f32, cT (B,H) f32)."""
    T, B, E = x_tbe.shape
    H = h0.shape[-1]

    # (1) Hoisted input projection, batched over the whole sequence.
    xg = matmul_bias_pallas(x_tbe.reshape(T * B, E).astype(wih_t.dtype),
                            wih_t, bias)                 # (T*B, 4H) f32
    xg = xg.reshape(T, B, 4 * H)

    # (2) Sequential recurrence with time chunked into the grid.
    TC = _pick_time_chunk(T)
    out, hT, cT = pl.pallas_call(
        _lstm_recurrence_kernel,
        out_shape=(jax.ShapeDtypeStruct((T, B, H), jnp.float32),
                   jax.ShapeDtypeStruct((B, H), jnp.float32),
                   jax.ShapeDtypeStruct((B, H), jnp.float32)),
        grid=(T // TC,),
        in_specs=[
            pl.BlockSpec((TC, B, 4 * H), lambda s: (s, 0, 0)),   # xg chunk
            pl.BlockSpec((H, 4 * H), lambda s: (0, 0)),          # W_hh^T (bf16)
            pl.BlockSpec((B, H), lambda s: (0, 0)),              # h0
            pl.BlockSpec((B, H), lambda s: (0, 0)),              # c0
        ],
        out_specs=(
            pl.BlockSpec((TC, B, H), lambda s: (s, 0, 0)),       # hidden chunk
            pl.BlockSpec((B, H), lambda s: (0, 0)),              # h_final
            pl.BlockSpec((B, H), lambda s: (0, 0)),              # c_final
        ),
        scratch_shapes=[pltpu.VMEM((B, H), jnp.float32),
                        pltpu.VMEM((B, H), jnp.float32)],
        compiler_params=pltpu.CompilerParams(
            dimension_semantics=("arbitrary",),
            vmem_limit_bytes=32 * 1024 * 1024),
    )(xg, whh_t, h0, c0)
    return out, hT, cT


# ----------------------------------------------------------------------------
# Model glue (plain JAX): embedding gather, layer stacking, transposes.
# ----------------------------------------------------------------------------
def multilayer_lstm(x_bte, layer_params, h0_layers, c0_layers):
    x = jnp.transpose(x_bte, (1, 0, 2))                  # time-major (T, B, E)
    hs, cs = [], []
    for l, (wih_t, whh_t, bias) in enumerate(layer_params):
        x, hT, cT = lstm_layer_pallas(x, wih_t, whh_t, bias,
                                      h0_layers[l], c0_layers[l])
        hs.append(hT)
        cs.append(cT)
    return jnp.transpose(x, (1, 0, 2)), jnp.stack(hs), jnp.stack(cs)


def seq2seq_forward(params, title, text):
    # dropout is identity (eval-mode forward)
    B = title.shape[0]
    H = params["hidden_size"]
    L = params["num_layers"]

    # TODO(synk): embedding gather has no clean tiled-Pallas form at this size;
    # it stays as a plain JAX jnp.take.
    emb_title = jnp.take(params["embedding"], title, axis=0)   # (B, Ts, E)
    emb_text = jnp.take(params["embedding"], text, axis=0)     # (B, Td, E)

    zeros = jnp.zeros((L, B, H), jnp.float32)
    _, enc_h, enc_c = multilayer_lstm(emb_title, params["encoder"], zeros, zeros)
    dec_out, _, _ = multilayer_lstm(emb_text, params["decoder"], enc_h, enc_c)

    Bd, Td, _ = dec_out.shape
    logits = matmul_bias_pallas(
        dec_out.reshape(Bd * Td, H).astype(params["fc_w"].dtype),
        params["fc_w"], params["fc_b"])
    return logits.reshape(Bd, Td, -1)


# ----------------------------------------------------------------------------
# Pure-JAX reference that mirrors the kernel's bf16 matmul inputs / f32
# accumulation, so tolerances can stay tight.
# ----------------------------------------------------------------------------
def _bf16_mm(a, w_bf16):
    return jnp.dot(a.astype(jnp.bfloat16).astype(jnp.float32),
                   w_bf16.astype(jnp.float32),
                   precision=lax.Precision.HIGHEST)


def _lstm_layer_ref(x_tbe, wih_t, whh_t, bias, h0, c0):
    def step(carry, xt):
        h, c = carry
        gates = _bf16_mm(xt, wih_t) + bias + _bf16_mm(h, whh_t)
        i, f, g, o = jnp.split(gates, 4, axis=-1)
        i, f, o = jax.nn.sigmoid(i), jax.nn.sigmoid(f), jax.nn.sigmoid(o)
        g = jnp.tanh(g)
        c = f * c + i * g
        h = o * jnp.tanh(c)
        return (h, c), h

    (hT, cT), out = lax.scan(step, (h0, c0), x_tbe)
    return out, hT, cT


def seq2seq_ref(params, title, text):
    B = title.shape[0]
    H = params["hidden_size"]
    L = params["num_layers"]
    emb_title = jnp.take(params["embedding"], title, axis=0)
    emb_text = jnp.take(params["embedding"], text, axis=0)

    def run(x_bte, layer_params, h0s, c0s):
        x = jnp.transpose(x_bte, (1, 0, 2))
        hs, cs = [], []
        for l, (wih_t, whh_t, b) in enumerate(layer_params):
            x, hT, cT = _lstm_layer_ref(x, wih_t, whh_t, b, h0s[l], c0s[l])
            hs.append(hT)
            cs.append(cT)
        return jnp.transpose(x, (1, 0, 2)), jnp.stack(hs), jnp.stack(cs)

    zeros = jnp.zeros((L, B, H), jnp.float32)
    _, eh, ec = run(emb_title, params["encoder"], zeros, zeros)
    dec_out, _, _ = run(emb_text, params["decoder"], eh, ec)
    return _bf16_mm(dec_out, params["fc_w"]) + params["fc_b"]


# ----------------------------------------------------------------------------
# Deterministic parameter init (PyTorch-like shapes; synthetic values).
# Matmul weights stored in bf16 (MXU-native); biases / embedding in f32.
# ----------------------------------------------------------------------------
def init_params(key, vocab_size, embed_size, hidden_size, num_layers):
    keys = iter(jax.random.split(key, 64))
    k = 1.0 / jnp.sqrt(hidden_size)

    def uni(shape):
        return jax.random.uniform(next(keys), shape, jnp.float32, -k, k)

    def lstm_stack(input_size):
        layers = []
        for l in range(num_layers):
            in_sz = input_size if l == 0 else hidden_size
            w_ih = uni((4 * hidden_size, in_sz))      # PyTorch weight_ih_l{l}
            w_hh = uni((4 * hidden_size, hidden_size))
            b_ih = uni((4 * hidden_size,))
            b_hh = uni((4 * hidden_size,))
            layers.append((w_ih.T.astype(jnp.bfloat16),
                           w_hh.T.astype(jnp.bfloat16),
                           (b_ih + b_hh)))            # (4H,) f32
        return layers

    return {
        "hidden_size": hidden_size,
        "num_layers": num_layers,
        "embedding": jax.random.normal(next(keys), (vocab_size, embed_size),
                                       jnp.float32),
        "encoder": lstm_stack(embed_size),
        "decoder": lstm_stack(embed_size),
        "fc_w": uni((vocab_size, hidden_size)).T.astype(jnp.bfloat16),  # (H, V)
        "fc_b": uni((vocab_size,)),
    }


if __name__ == "__main__":
    vocab_size, embed_size, hidden_size, num_layers = 50, 32, 32, 2
    B, T_title, T_text = 2, 8, 8

    params = init_params(jax.random.PRNGKey(0), vocab_size, embed_size,
                         hidden_size, num_layers)

    k1, k2 = jax.random.split(jax.random.PRNGKey(1))
    title = jax.random.randint(k1, (B, T_title), 0, vocab_size, jnp.int32)
    text = jax.random.randint(k2, (B, T_text), 0, vocab_size, jnp.int32)

    out = jax.block_until_ready(seq2seq_forward(params, title, text))
    ref = jax.block_until_ready(seq2seq_ref(params, title, text))

    assert out.shape == (B, T_text, vocab_size), out.shape
    # Reference mirrors the kernel's bf16 matmul inputs, so tolerance is tight.
    assert jnp.allclose(out, ref, rtol=5e-3, atol=5e-3), \
        float(jnp.max(jnp.abs(out - ref)))
    print("KERNEL_OK")
</pallas_src>

<mosaic_0001>
module attributes {stable_mosaic.version = 11 : i64} {
  func.func @_matmul_bias_kernel(%arg0: i32, %arg1: i32, %arg2: i32, %arg3: memref<16x32xbf16, #tpu.memory_space<vmem>>, %arg4: memref<32x128xbf16, #tpu.memory_space<vmem>>, %arg5: memref<1x128xf32, #tpu.memory_space<vmem>>, %arg6: memref<16x128xf32, #tpu.memory_space<vmem>>, %arg7: memref<16x128xf32, #tpu.memory_space<vmem>>) attributes {dimension_semantics = [#tpu.dimension_semantics<parallel>, #tpu.dimension_semantics<parallel>, #tpu.dimension_semantics<arbitrary>], iteration_bounds = array<i64: 1, 1, 1>, scalar_prefetch = 0 : i64, scratch_operands = 1 : i64, tpu.core_type = #tpu.core_type<tc>, window_params = [{transform_indices = @transform_0, window_bounds = array<i64: 16, 32>}, {transform_indices = @transform_1, window_bounds = array<i64: 32, 128>}, {transform_indices = @transform_2, window_bounds = array<i64: 1, 128>}, {transform_indices = @transform_3, window_bounds = array<i64: 16, 128>}]} {
    %c0_i32 = arith.constant 0 : i32
    %0 = arith.cmpi eq, %arg2, %c0_i32 : i32
    %1 = arith.extui %0 : i1 to i32
    %c0_i32_0 = arith.constant 0 : i32
    %2 = arith.cmpi ne, %1, %c0_i32_0 : i32
    scf.if %2 {
      %cst_10 = arith.constant 0.000000e+00 : f32
      %12 = vector.broadcast %cst_10 : f32 to vector<16x128xf32>
      %c0_11 = arith.constant 0 : index
      %c0_12 = arith.constant 0 : index
      %13 = vector.load %arg7[%c0_11, %c0_12] : memref<16x128xf32, #tpu.memory_space<vmem>>, vector<16x128xf32>
      tpu.vector_store %arg7[%c0_11, %c0_12], %12 {strides = array<i32>} : memref<16x128xf32, #tpu.memory_space<vmem>>, vector<16x128xf32>,
    } else {
    }
    %c0 = arith.constant 0 : index
    %c0_1 = arith.constant 0 : index
    %3 = vector.load %arg7[%c0, %c0_1] : memref<16x128xf32, #tpu.memory_space<vmem>>, vector<16x128xf32>
    %c0_2 = arith.constant 0 : index
    %c0_3 = arith.constant 0 : index
    %4 = vector.load %arg3[%c0_2, %c0_3] : memref<16x32xbf16, #tpu.memory_space<vmem>>, vector<16x32xbf16>
    %c0_4 = arith.constant 0 : index
    %c0_5 = arith.constant 0 : index
    %5 = vector.load %arg4[%c0_4, %c0_5] : memref<32x128xbf16, #tpu.memory_space<vmem>>, vector<32x128xbf16>
    %cst = arith.constant dense<0.000000e+00> : vector<16x128xf32>
    %6 = tpu.matmul %4, %5, %cst {dimension_numbers = #tpu.dot_dimension_numbers<[1], [0], [0], [1], [0, 0, 1, 1], [], []>} : vector<16x32xbf16>, vector<32x128xbf16>, vector<16x128xf32> -> vector<16x128xf32>
    %7 = arith.addf %3, %6 : vector<16x128xf32>
    %c0_6 = arith.constant 0 : index
    %c0_7 = arith.constant 0 : index
    %8 = vector.load %arg7[%c0_6, %c0_7] : memref<16x128xf32, #tpu.memory_space<vmem>>, vector<16x128xf32>
    tpu.vector_store %arg7[%c0_6, %c0_7], %7 {strides = array<i32>} : memref<16x128xf32, #tpu.memory_space<vmem>>, vector<16x128xf32>,
    %c0_i32_8 = arith.constant 0 : i32
    %9 = arith.cmpi eq, %arg2, %c0_i32_8 : i32
    %10 = arith.extui %9 : i1 to i32
    %c0_i32_9 = arith.constant 0 : i32
    %11 = arith.cmpi ne, %10, %c0_i32_9 : i32
    scf.if %11 {
      %c0_10 = arith.constant 0 : index
      %c0_11 = arith.constant 0 : index
      %12 = vector.load %arg7[%c0_10, %c0_11] : memref<16x128xf32, #tpu.memory_space<vmem>>, vector<16x128xf32>
      %c0_12 = arith.constant 0 : index
      %c0_13 = arith.constant 0 : index
      %13 = vector.load %arg5[%c0_12, %c0_13] : memref<1x128xf32, #tpu.memory_space<vmem>>, vector<1x128xf32>
      %14 = vector.broadcast %13 : vector<1x128xf32> to vector<16x128xf32>
      %15 = arith.addf %12, %14 : vector<16x128xf32>
      %c0_14 = arith.constant 0 : index
      %c0_15 = arith.constant 0 : index
      %16 = vector.load %arg6[%c0_14, %c0_15] : memref<16x128xf32, #tpu.memory_space<vmem>>, vector<16x128xf32>
      tpu.vector_store %arg6[%c0_14, %c0_15], %15 {strides = array<i32>} : memref<16x128xf32, #tpu.memory_space<vmem>>, vector<16x128xf32>,
    } else {
    }
    return
  }
  func.func @transform_0(%arg0: i32, %arg1: i32, %arg2: i32) -> (i32, i32) {
    %c0_i32 = arith.constant 0 : i32
    return %arg0, %arg2 : i32, i32
  }
  func.func @transform_1(%arg0: i32, %arg1: i32, %arg2: i32) -> (i32, i32) {
    %c0_i32 = arith.constant 0 : i32
    return %arg2, %arg1 : i32, i32
  }
  func.func @transform_2(%arg0: i32, %arg1: i32, %arg2: i32) -> (i32, i32) {
    %c0_i32 = arith.constant 0 : i32
    %c0_i32_0 = arith.constant 0 : i32
    return %c0_i32, %arg1 : i32, i32
  }
  func.func @transform_3(%arg0: i32, %arg1: i32, %arg2: i32) -> (i32, i32) {
    %c0_i32 = arith.constant 0 : i32
    return %arg0, %arg1 : i32, i32
  }
}

</mosaic_0001>

<bundles_post_ra>
// kernel: tpu_custom_call.1
= control target key start
LH: loop header
LB: loop body
LE: loop exit
PB: predicated region body
PF: predicated region fallthrough
CT: control target
= control target key end

     0   :  { %8 = vsyncpa [#allocation4], 0  ;;  %s293_s0 = inlined_call_operand.hbm [shape: bf16[16,32], index: 0, kind: input, shape index: {}]   ;;  %s294_s1 = inlined_call_operand.hbm [shape: bf16[32,128], index: 1, kind: input, shape index: {}]   ;;  %s295_s2 = inlined_call_operand.vmem [shape: f32[1,128], index: 2, kind: input, shape index: {}]   ;;  %s296_s3 = inlined_call_operand.hbm [shape: f32[16,128], index: 3, kind: output, shape index: {}]  }
   0x1   :  { %9 = vsyncpa [#allocation7], 0 }
   0x2   :  { %10 = vsyncpa [#allocation5], 0  ;;  %s252_s12 = smov [#allocation3]  }
   0x3   :  { %s16_s13 = sshll.u32 %s252_s12, 4  ;;  %s17_s13 = int_to_ptr.vmem [resolvable:$true] %s16_s13 }
   0x4   :  { %s194_s14 = scalar_lea.vmem %s17_s13, 128  ;;  %p199_p1 = scmp.lt.s32.totalorder %s17_s13, %s17_s13 }
   0x5   :  { %p195_p0 = scmp.ne.s32.totalorder %s17_s13, %s194_s14  ;;  %p200_p2 = scmp.lt.s32.totalorder %s194_s14, %s194_s14 }
   0x7   :  { %p201_p3 = por %p200_p2, %p199_p1 }
   0x9   :  { %p202_p4 = pnand %p201_p3, %p195_p0 }
   0xb   :  { %205 = shalt.err (!%p202_p4)
}
   0xc   :  { %s253_s15 = smov 64   ;;  %s254_s16 = smov 4  }
   0xd   :  { %22 = dma.hbm_to_vmem [thread:$0]  %s293_s0, 128, %s17_s13, [#allocation4], %s253_s15, %s253_s15, %s254_s16  }
   0xe   :  { %s255_s19 = smov [#allocation6]  }
   0xf   :  { %s28_s20 = sshll.u32 %s255_s19, 4  ;;  %s29_s20 = int_to_ptr.vmem [resolvable:$true] %s28_s20 }
  0x10   :  { %s214_s21 = scalar_lea.vmem %s29_s20, 256  ;;  %p219_p6 = scmp.lt.s32.totalorder %s29_s20, %s29_s20 }
  0x11   :  { %p215_p5 = scmp.ne.s32.totalorder %s29_s20, %s214_s21  ;;  %p220_p7 = scmp.lt.s32.totalorder %s214_s21, %s214_s21 }
  0x13   :  { %p221_p8 = por %p220_p7, %p219_p6 }
  0x15   :  { %p222_p9 = pnand %p221_p8, %p215_p5 }
  0x17   :  { %225 = shalt.err (!%p222_p9)
}
  0x18   :  { %34 = dma.hbm_to_vmem [thread:$0]  %s294_s1, 256, %s29_s20, [#allocation7], %s253_s15, %s253_s15, %s254_s16  }
  0x19   :  { %246 = dma.done.wait [#allocation4], 128  }
  0x1a   :  { %247 = vsyncadd [#allocation4], 4294967168 }
  0x1b   :  { %248 = dma.done.wait [#allocation7], 256  }
  0x1c   :  { %249 = vsyncadd [#allocation7], 4294967040  ;;  %v256_v0 = vmov 0.0   ;;  %vm257_vm0 = vmmov 0   ;;  %v183_v1 = vld [vmem:[#allocation6 + $0x8] sm:$0xff]   ;;  %v184_v2 = vld [vmem:[#allocation6] sm:$0xff]  }
  0x1d   :  { %166 = vmatprep.subr.bf16.mxu0 %v256_v0  ;;  %170 = vmatprep.mubr.msk.bf16.mxu0 %vm257_vm0, %v256_v0  ;;  %v185_v3 = vld [vmem:[#allocation3] sm:$0xff]   ;;  %vm75_vm1 = vcmask 261120   ;;  %s258_s1 = smov [#allocation8]  }
  0x1e   :  { %167 = vmatpush3.bf16.msra.mxu0 %v183_v1  ;;  %v162_v4 = vld [vmem:[%s295_s2] ss:$0 sm:$0xff]  ;;  %s145_s25 = sshll.u32 %s258_s1, 4  ;;  %s146_s25 = int_to_ptr.vmem [resolvable:$true] %s145_s25 }
  0x1f   :  { %168 = vmatprep.subr.bf16.mxu0 %v256_v0  ;;  %s226_s26 = scalar_lea.vmem %s146_s25, 256  ;;  %p231_p11 = scmp.lt.s32.totalorder %s146_s25, %s146_s25 }
  0x20   :  { %p227_p10 = scmp.ne.s32.totalorder %s146_s25, %s226_s26  ;;  %p232_p12 = scmp.lt.s32.totalorder %s226_s26, %s226_s26 }
  0x22   :  { %169 = vmatpush3.bf16.msra.mxu0 %v184_v2  ;;  %p233_p13 = por %p232_p12, %p231_p11 }
  0x24   :  { %p234_p0 = pnand %p233_p13, %p227_p10 }
  0x25   :  { %171 = vmatmul.mubr.msk.bf16.vlgmr.msra.gmra.mxu0 %vm75_vm1, %v185_v3 }
  0xe5   :  { %v113_v5 = vpop.f32.mrf.mxu0 }
  0xe6   :  { %v136_v6 = vadd.f32 %v162_v4, %v113_v5 }
  0xe7   :  { %v172_v7 = vpop.f32.mrf.mxu0 }
  0xe8   :  { %138 = vst [vmem:[#allocation8] sm:$0xff] %v136_v6 }
  0xe9   :  { %v116_v8 = vpop.f32.mrf.mxu0 }
  0xea   :  { %v137_v9 = vadd.f32 %v162_v4, %v116_v8 }
  0xeb   :  { %v173_v10 = vpop.f32.mrf.mxu0 }
  0xec   :  { %139 = vst [vmem:[#allocation8 + $0x8] sm:$0xff] %v137_v9 }
  0xed   :  { %237 = shalt.err (!%p234_p0)
}
  0xee   :  { %s259_s27 = smov 128   ;;  %s260_s2 = smov 8  }
  0xef   :  { %151 = dma.vmem_to_hbm [thread:$0]  %s146_s25, 256, %s296_s3, [#allocation5], %s259_s27, %s259_s27, %s260_s2  }
  0xf0   :  { %250 = dma.done.wait [#allocation5], 256  }
  0xf1   :  { %251 = vsyncadd [#allocation5], 4294967040 }
  0xf2   :  { %155 = vsyncpa [#allocation4], 1 }
  0xf3   :  { %156 = vsyncpa [#allocation7], 1 }
  0xf4   :  { %157 = vsyncpa [#allocation5], 1 }

</bundles_post_ra>
